<compile_context>
chip_gen: v6e
topology: v6e:2x2x1
jax: 0.10.0
libtpu: 0.0.40
codegen_flags: <defaults>
</compile_context>

<pallas_src>
import jax
import jax.numpy as jnp
from jax import lax
from jax.experimental import pallas as pl
from jax.experimental.pallas import tpu as pltpu

_LANE = 128


def _round_up(v, m):
    return ((v + m - 1) // m) * m


def _band_weights(w, w_in):
    """Expand (K, K, C_in, C_out) conv weights into row-banded matmul weights.

    Returns band of shape (K, W_in*C_in, W_out*C_out) with
        band[ky, (j+kx)*C_in + c, j*C_out + o] = w[ky, kx, c, o]
    so a valid conv over (kx, c) for a fixed ky is one lane-dense matmul on
    the flattened (W*C) axis:  conv(x)[n, i, :] = sum_ky x[n, i+ky, :] @ band[ky].
    """
    K, _, c_in, c_out = w.shape
    w_out = w_in - K + 1
    band = jnp.zeros((K, w_in, c_in, w_out, c_out), w.dtype)
    for kx in range(K):
        # eye[j+kx, j] = 1  <=>  col - row == -kx
        eye = jnp.eye(w_in, w_out, k=-kx, dtype=w.dtype)
        band = band + jnp.einsum("ab,kco->kacbo", eye, w[:, kx])
    return band.reshape(K, w_in * c_in, w_out * c_out)


def _two_conv_kernel(x_ref, w1_ref, b1_ref, w2_ref, b2_ref, o_ref):
    """Fused conv->relu->conv->relu for one image (batch dim squeezed away).

    x_ref : (H,  W*C_in)              activations, compute dtype (bf16/f32)
    w1_ref: (K, W*C_in,   WF_MID_P)   banded conv1 weights (lane-padded)
    b1_ref: (1, WF_MID_P)             conv1 bias tiled over W1, f32
    w2_ref: (K, WF_MID_P, WF_OUT_P)   banded conv2 weights (lane-padded)
    b2_ref: (1, WF_OUT_P)             conv2 bias tiled over W2, f32
    o_ref : (H2, WF_OUT_P)            output slab, f32
    """
    h = x_ref.shape[0]
    k = w1_ref.shape[0]
    h1 = h - (k - 1)
    h2 = h1 - (k - 1)

    x = x_ref[...]                                      # (H, W*C_in)

    # ---- conv1 + relu: K row-shifted lane-dense matmuls, bias in ky==0 -----
    acc1 = jnp.dot(x[0:h1], w1_ref[0],
                   preferred_element_type=jnp.float32) + b1_ref[...]
    for ky in range(1, k):
        acc1 = acc1 + jnp.dot(x[ky:ky + h1], w1_ref[ky],
                              preferred_element_type=jnp.float32)
    # Padded lanes of acc1 are exactly b1-pad == 0, so relu keeps them 0 and
    # the corresponding (zero) rows of w2 make them inert in conv2.
    mid = jnp.maximum(acc1, 0.0).astype(w2_ref.dtype)   # (H1, WF_MID_P)

    # ---- conv2 + relu -------------------------------------------------------
    acc2 = jnp.dot(mid[0:h2], w2_ref[0],
                   preferred_element_type=jnp.float32) + b2_ref[...]
    for ky in range(1, k):
        acc2 = acc2 + jnp.dot(mid[ky:ky + h2], w2_ref[ky],
                              preferred_element_type=jnp.float32)

    o_ref[...] = jnp.maximum(acc2, 0.0).astype(o_ref.dtype)


def two_conv_group(x_nchw, w1, b1, w2, b2, *, compute_dtype=jnp.bfloat16):
    """x_nchw: (N, C_in, H, W); w*: (K, K, Cin, Cout) HWIO; b*: (Cout,).

    Returns (N, C_out, H-2(K-1), W-2(K-1)), matching the PyTorch module.
    compute_dtype: MXU operand dtype (bf16 default; float32 for exact match).
    """
    N, C_in, H, W = x_nchw.shape
    K = w1.shape[0]
    C_out = w1.shape[-1]
    H1, W1 = H - K + 1, W - K + 1
    H2, W2 = H1 - K + 1, W1 - K + 1

    wf_in = W * C_in
    wf_mid = W1 * C_out
    wf_out = W2 * C_out
    wf_mid_p = _round_up(wf_mid, _LANE)   # lane-pad to 128 multiples
    wf_out_p = _round_up(wf_out, _LANE)

    # Lane-flattened NHWC activations: (N, H, W*C_in), MXU operand dtype.
    # (The NCHW<->NHWC transposes would be dropped if the surrounding graph
    #  already provided/consumed NHWC; kept here to match the PyTorch API.)
    x_flat = (jnp.transpose(x_nchw, (0, 2, 3, 1))
              .reshape(N, H, wf_in).astype(compute_dtype))

    # Banded, lane-padded weights + tiled, lane-padded biases (param prep).
    w1b = _band_weights(w1.astype(jnp.float32), W)      # (K, wf_in,  wf_mid)
    w1b = jnp.pad(w1b, ((0, 0), (0, 0), (0, wf_mid_p - wf_mid)))
    w1b = w1b.astype(compute_dtype)                     # (K, wf_in,  wf_mid_p)
    w2b = _band_weights(w2.astype(jnp.float32), W1)     # (K, wf_mid, wf_out)
    w2b = jnp.pad(w2b, ((0, 0), (0, wf_mid_p - wf_mid), (0, wf_out_p - wf_out)))
    w2b = w2b.astype(compute_dtype)                     # (K, wf_mid_p, wf_out_p)
    b1t = jnp.pad(jnp.tile(b1.astype(jnp.float32), W1),
                  (0, wf_mid_p - wf_mid))[None, :]      # (1, wf_mid_p)
    b2t = jnp.pad(jnp.tile(b2.astype(jnp.float32), W2),
                  (0, wf_out_p - wf_out))[None, :]      # (1, wf_out_p)

    def _run(weight_pipeline_mode):
        wkw = ({} if weight_pipeline_mode is None
               else {"pipeline_mode": weight_pipeline_mode})
        in_specs = [
            # One image per grid step; batch dim squeezed -> 2-D kernel tiles.
            pl.BlockSpec((None, H, wf_in), lambda n: (n, 0, 0)),
            pl.BlockSpec((K, wf_in, wf_mid_p), lambda n: (0, 0, 0), **wkw),
            pl.BlockSpec((1, wf_mid_p), lambda n: (0, 0), **wkw),
            pl.BlockSpec((K, wf_mid_p, wf_out_p), lambda n: (0, 0, 0), **wkw),
            pl.BlockSpec((1, wf_out_p), lambda n: (0, 0), **wkw),
        ]
        return pl.pallas_call(
            _two_conv_kernel,
            out_shape=jax.ShapeDtypeStruct((N, H2, wf_out_p), jnp.float32),
            grid_spec=pltpu.PrefetchScalarGridSpec(
                num_scalar_prefetch=0,
                grid=(N,),
                in_specs=in_specs,
                out_specs=pl.BlockSpec((None, H2, wf_out_p),
                                       lambda n: (n, 0, 0)),
            ),
            compiler_params=pltpu.CompilerParams(
                dimension_semantics=("parallel",)),
        )(x_flat, w1b, b1t, w2b, b2t)

    try:
        # Grid-invariant weights/biases: single-buffer them (double-buffering
        # a constant block is pure VMEM waste).
        out_flat = _run(pl.Buffered(1))
    except Exception:
        # Fallback if this Pallas build rejects Buffered(1) on the top-level
        # pipeline; correctness is identical, only the weight VMEM doubles.
        out_flat = _run(None)

    # Drop the zero pad lanes, un-flatten, and return NCHW like the module.
    out_nhwc = out_flat[:, :, :wf_out].reshape(N, H2, W2, C_out)
    return jnp.transpose(out_nhwc, (0, 3, 1, 2))


def _reference(x_nchw, w1, b1, w2, b2):
    """Pure-JAX reference using lax.conv_general_dilated (NCHW, valid)."""
    def conv(x, w, b):
        w_oihw = jnp.transpose(w, (3, 2, 0, 1))    # HWIO -> OIHW
        y = lax.conv_general_dilated(
            x, w_oihw, window_strides=(1, 1), padding="VALID",
            dimension_numbers=("NCHW", "OIHW", "NCHW"))
        return jnp.maximum(y + b[None, :, None, None], 0.0)
    return conv(conv(x_nchw, w1, b1), w2, b2)


if __name__ == "__main__":
    # Small shapes consistent with the module's forward.
    N, C_in, C_out, H, W, K = 2, 4, 8, 16, 16, 3

    key = jax.random.PRNGKey(0)
    kx, kw1, kb1, kw2, kb2 = jax.random.split(key, 5)

    x = jax.random.normal(kx, (N, C_in, H, W), dtype=jnp.float32)
    w1 = jax.random.normal(kw1, (K, K, C_in, C_out), dtype=jnp.float32) * 0.1
    b1 = jax.random.normal(kb1, (C_out,), dtype=jnp.float32) * 0.1
    w2 = jax.random.normal(kw2, (K, K, C_out, C_out), dtype=jnp.float32) * 0.1
    b2 = jax.random.normal(kb2, (C_out,), dtype=jnp.float32) * 0.1

    ref = jax.block_until_ready(_reference(x, w1, b1, w2, b2))
    assert ref.shape == (N, C_out, H - 2 * (K - 1), W - 2 * (K - 1))

    # Default path: bf16 MXU operands, f32 accumulation (loose tolerance).
    out_bf16 = jax.block_until_ready(two_conv_group(x, w1, b1, w2, b2))
    assert out_bf16.shape == ref.shape
    assert jnp.allclose(out_bf16, ref, atol=5e-2, rtol=5e-2)

    # f32 operand path: exact PyTorch-style numerics.
    out_f32 = jax.block_until_ready(
        two_conv_group(x, w1, b1, w2, b2, compute_dtype=jnp.float32))
    assert out_f32.shape == ref.shape
    assert jnp.allclose(out_f32, ref, atol=1e-4, rtol=1e-4)

    print("KERNEL_OK")
</pallas_src>

<mosaic_0001>
module attributes {stable_mosaic.version = 11 : i64} {
  func.func @_two_conv_kernel(%arg0: i32, %arg1: memref<1x16x64xbf16, #tpu.memory_space<vmem>>, %arg2: memref<3x64x128xbf16, #tpu.memory_space<vmem>>, %arg3: memref<1x128xf32, #tpu.memory_space<vmem>>, %arg4: memref<3x128x128xbf16, #tpu.memory_space<vmem>>, %arg5: memref<1x128xf32, #tpu.memory_space<vmem>>, %arg6: memref<1x12x128xf32, #tpu.memory_space<vmem>>) attributes {dimension_semantics = [#tpu.dimension_semantics<parallel>], iteration_bounds = array<i64: 2>, scalar_prefetch = 0 : i64, scratch_operands = 0 : i64, tpu.core_type = #tpu.core_type<tc>, window_params = [{transform_indices = @transform_0, window_bounds = array<i64: 1, 16, 64>}, {pipeline_mode = #tpu.pipeline_mode<synchronous>, transform_indices = @transform_1, window_bounds = array<i64: 3, 64, 128>}, {pipeline_mode = #tpu.pipeline_mode<synchronous>, transform_indices = @transform_2, window_bounds = array<i64: 1, 128>}, {pipeline_mode = #tpu.pipeline_mode<synchronous>, transform_indices = @transform_3, window_bounds = array<i64: 3, 128, 128>}, {pipeline_mode = #tpu.pipeline_mode<synchronous>, transform_indices = @transform_4, window_bounds = array<i64: 1, 128>}, {transform_indices = @transform_5, window_bounds = array<i64: 1, 12, 128>}]} {
    %c0 = arith.constant 0 : index
    %c0_0 = arith.constant 0 : index
    %c0_1 = arith.constant 0 : index
    %0 = vector.load %arg1[%c0, %c0_0, %c0_1] : memref<1x16x64xbf16, #tpu.memory_space<vmem>>, vector<1x16x64xbf16>
    %1 = vector.shape_cast %0 : vector<1x16x64xbf16> to vector<16x64xbf16>
    %2 = vector.extract_strided_slice %1 {offsets = [0, 0], sizes = [14, 64], strides = [1, 1]} : vector<16x64xbf16> to vector<14x64xbf16>
    %c0_2 = arith.constant 0 : index
    %c0_3 = arith.constant 0 : index
    %c0_4 = arith.constant 0 : index
    %3 = vector.load %arg2[%c0_2, %c0_3, %c0_4] : memref<3x64x128xbf16, #tpu.memory_space<vmem>>, vector<1x64x128xbf16>
    %4 = vector.shape_cast %3 : vector<1x64x128xbf16> to vector<64x128xbf16>
    %cst = arith.constant dense<0.000000e+00> : vector<14x128xf32>
    %5 = tpu.matmul %2, %4, %cst {dimension_numbers = #tpu.dot_dimension_numbers<[1], [0], [0], [1], [0, 0, 1, 1], [], []>} : vector<14x64xbf16>, vector<64x128xbf16>, vector<14x128xf32> -> vector<14x128xf32>
    %c0_5 = arith.constant 0 : index
    %c0_6 = arith.constant 0 : index
    %6 = vector.load %arg3[%c0_5, %c0_6] : memref<1x128xf32, #tpu.memory_space<vmem>>, vector<1x128xf32>
    %7 = vector.broadcast %6 : vector<1x128xf32> to vector<14x128xf32>
    %8 = arith.addf %5, %7 : vector<14x128xf32>
    %9 = vector.extract_strided_slice %1 {offsets = [1, 0], sizes = [14, 64], strides = [1, 1]} : vector<16x64xbf16> to vector<14x64xbf16>
    %c1 = arith.constant 1 : index
    %c0_7 = arith.constant 0 : index
    %c0_8 = arith.constant 0 : index
    %10 = vector.load %arg2[%c1, %c0_7, %c0_8] : memref<3x64x128xbf16, #tpu.memory_space<vmem>>, vector<1x64x128xbf16>
    %11 = vector.shape_cast %10 : vector<1x64x128xbf16> to vector<64x128xbf16>
    %cst_9 = arith.constant dense<0.000000e+00> : vector<14x128xf32>
    %12 = tpu.matmul %9, %11, %cst_9 {dimension_numbers = #tpu.dot_dimension_numbers<[1], [0], [0], [1], [0, 0, 1, 1], [], []>} : vector<14x64xbf16>, vector<64x128xbf16>, vector<14x128xf32> -> vector<14x128xf32>
    %13 = arith.addf %8, %12 : vector<14x128xf32>
    %14 = vector.extract_strided_slice %1 {offsets = [2, 0], sizes = [14, 64], strides = [1, 1]} : vector<16x64xbf16> to vector<14x64xbf16>
    %c2 = arith.constant 2 : index
    %c0_10 = arith.constant 0 : index
    %c0_11 = arith.constant 0 : index
    %15 = vector.load %arg2[%c2, %c0_10, %c0_11] : memref<3x64x128xbf16, #tpu.memory_space<vmem>>, vector<1x64x128xbf16>
    %16 = vector.shape_cast %15 : vector<1x64x128xbf16> to vector<64x128xbf16>
    %cst_12 = arith.constant dense<0.000000e+00> : vector<14x128xf32>
    %17 = tpu.matmul %14, %16, %cst_12 {dimension_numbers = #tpu.dot_dimension_numbers<[1], [0], [0], [1], [0, 0, 1, 1], [], []>} : vector<14x64xbf16>, vector<64x128xbf16>, vector<14x128xf32> -> vector<14x128xf32>
    %18 = arith.addf %13, %17 : vector<14x128xf32>
    %cst_13 = arith.constant 0.000000e+00 : f32
    %19 = vector.broadcast %cst_13 : f32 to vector<14x128xf32>
    %20 = arith.maximumf %18, %19 : vector<14x128xf32>
    %21 = arith.truncf %20 : vector<14x128xf32> to vector<14x128xbf16>
    %22 = vector.extract_strided_slice %21 {offsets = [0, 0], sizes = [12, 128], strides = [1, 1]} : vector<14x128xbf16> to vector<12x128xbf16>
    %c0_14 = arith.constant 0 : index
    %c0_15 = arith.constant 0 : index
    %c0_16 = arith.constant 0 : index
    %23 = vector.load %arg4[%c0_14, %c0_15, %c0_16] : memref<3x128x128xbf16, #tpu.memory_space<vmem>>, vector<1x128x128xbf16>
    %24 = vector.shape_cast %23 : vector<1x128x128xbf16> to vector<128x128xbf16>
    %cst_17 = arith.constant dense<0.000000e+00> : vector<12x128xf32>
    %25 = tpu.matmul %22, %24, %cst_17 {dimension_numbers = #tpu.dot_dimension_numbers<[1], [0], [0], [1], [0, 0, 1, 1], [], []>} : vector<12x128xbf16>, vector<128x128xbf16>, vector<12x128xf32> -> vector<12x128xf32>
    %c0_18 = arith.constant 0 : index
    %c0_19 = arith.constant 0 : index
    %26 = vector.load %arg5[%c0_18, %c0_19] : memref<1x128xf32, #tpu.memory_space<vmem>>, vector<1x128xf32>
    %27 = vector.broadcast %26 : vector<1x128xf32> to vector<12x128xf32>
    %28 = arith.addf %25, %27 : vector<12x128xf32>
    %29 = vector.extract_strided_slice %21 {offsets = [1, 0], sizes = [12, 128], strides = [1, 1]} : vector<14x128xbf16> to vector<12x128xbf16>
    %c1_20 = arith.constant 1 : index
    %c0_21 = arith.constant 0 : index
    %c0_22 = arith.constant 0 : index
    %30 = vector.load %arg4[%c1_20, %c0_21, %c0_22] : memref<3x128x128xbf16, #tpu.memory_space<vmem>>, vector<1x128x128xbf16>
    %31 = vector.shape_cast %30 : vector<1x128x128xbf16> to vector<128x128xbf16>
    %cst_23 = arith.constant dense<0.000000e+00> : vector<12x128xf32>
    %32 = tpu.matmul %29, %31, %cst_23 {dimension_numbers = #tpu.dot_dimension_numbers<[1], [0], [0], [1], [0, 0, 1, 1], [], []>} : vector<12x128xbf16>, vector<128x128xbf16>, vector<12x128xf32> -> vector<12x128xf32>
    %33 = arith.addf %28, %32 : vector<12x128xf32>
    %34 = vector.extract_strided_slice %21 {offsets = [2, 0], sizes = [12, 128], strides = [1, 1]} : vector<14x128xbf16> to vector<12x128xbf16>
    %c2_24 = arith.constant 2 : index
    %c0_25 = arith.constant 0 : index
    %c0_26 = arith.constant 0 : index
    %35 = vector.load %arg4[%c2_24, %c0_25, %c0_26] : memref<3x128x128xbf16, #tpu.memory_space<vmem>>, vector<1x128x128xbf16>
    %36 = vector.shape_cast %35 : vector<1x128x128xbf16> to vector<128x128xbf16>
    %cst_27 = arith.constant dense<0.000000e+00> : vector<12x128xf32>
    %37 = tpu.matmul %34, %36, %cst_27 {dimension_numbers = #tpu.dot_dimension_numbers<[1], [0], [0], [1], [0, 0, 1, 1], [], []>} : vector<12x128xbf16>, vector<128x128xbf16>, vector<12x128xf32> -> vector<12x128xf32>
    %38 = arith.addf %33, %37 : vector<12x128xf32>
    %cst_28 = arith.constant 0.000000e+00 : f32
    %39 = vector.broadcast %cst_28 : f32 to vector<12x128xf32>
    %40 = arith.maximumf %38, %39 : vector<12x128xf32>
    %c0_29 = arith.constant 0 : index
    %c0_30 = arith.constant 0 : index
    %c0_31 = arith.constant 0 : index
    %41 = vector.load %arg6[%c0_29, %c0_30, %c0_31] : memref<1x12x128xf32, #tpu.memory_space<vmem>>, vector<1x12x128xf32>
    %42 = vector.shape_cast %41 : vector<1x12x128xf32> to vector<12x128xf32>
    %43 = vector.shape_cast %40 : vector<12x128xf32> to vector<1x12x128xf32>
    tpu.vector_store %arg6[%c0_29, %c0_30, %c0_31], %43 {strides = array<i32>} : memref<1x12x128xf32, #tpu.memory_space<vmem>>, vector<1x12x128xf32>,
    return
  }
  func.func @transform_0(%arg0: i32) -> (i32, i32, i32) {
    %c0_i32 = arith.constant 0 : i32
    %c0_i32_0 = arith.constant 0 : i32
    %c0_i32_1 = arith.constant 0 : i32
    return %arg0, %c0_i32, %c0_i32_0 : i32, i32, i32
  }
  func.func @transform_1(%arg0: i32) -> (i32, i32, i32) {
    %c0_i32 = arith.constant 0 : i32
    %c0_i32_0 = arith.constant 0 : i32
    %c0_i32_1 = arith.constant 0 : i32
    %c0_i32_2 = arith.constant 0 : i32
    return %c0_i32, %c0_i32_0, %c0_i32_1 : i32, i32, i32
  }
  func.func @transform_2(%arg0: i32) -> (i32, i32) {
    %c0_i32 = arith.constant 0 : i32
    %c0_i32_0 = arith.constant 0 : i32
    %c0_i32_1 = arith.constant 0 : i32
    return %c0_i32, %c0_i32_0 : i32, i32
  }
  func.func @transform_3(%arg0: i32) -> (i32, i32, i32) {
    %c0_i32 = arith.constant 0 : i32
    %c0_i32_0 = arith.constant 0 : i32
    %c0_i32_1 = arith.constant 0 : i32
    %c0_i32_2 = arith.constant 0 : i32
    return %c0_i32, %c0_i32_0, %c0_i32_1 : i32, i32, i32
  }
  func.func @transform_4(%arg0: i32) -> (i32, i32) {
    %c0_i32 = arith.constant 0 : i32
    %c0_i32_0 = arith.constant 0 : i32
    %c0_i32_1 = arith.constant 0 : i32
    return %c0_i32, %c0_i32_0 : i32, i32
  }
  func.func @transform_5(%arg0: i32) -> (i32, i32, i32) {
    %c0_i32 = arith.constant 0 : i32
    %c0_i32_0 = arith.constant 0 : i32
    %c0_i32_1 = arith.constant 0 : i32
    return %arg0, %c0_i32, %c0_i32_0 : i32, i32, i32
  }
}

module attributes {stable_mosaic.version = 11 : i64} {
  func.func @_two_conv_kernel(%arg0: i32, %arg1: memref<1x16x64xbf16, #tpu.memory_space<vmem>>, %arg2: memref<3x64x128xbf16, #tpu.memory_space<vmem>>, %arg3: memref<1x128xf32, #tpu.memory_space<vmem>>, %arg4: memref<3x128x128xbf16, #tpu.memory_space<vmem>>, %arg5: memref<1x128xf32, #tpu.memory_space<vmem>>, %arg6: memref<1x12x128xf32, #tpu.memory_space<vmem>>) attributes {dimension_semantics = [#tpu.dimension_semantics<parallel>], iteration_bounds = array<i64: 2>, scalar_prefetch = 0 : i64, scratch_operands = 0 : i64, tpu.core_type = #tpu.core_type<tc>, window_params = [{transform_indices = @transform_0, window_bounds = array<i64: 1, 16, 64>}, {pipeline_mode = #tpu.pipeline_mode<synchronous>, transform_indices = @transform_1, window_bounds = array<i64: 3, 64, 128>}, {pipeline_mode = #tpu.pipeline_mode<synchronous>, transform_indices = @transform_2, window_bounds = array<i64: 1, 128>}, {pipeline_mode = #tpu.pipeline_mode<synchronous>, transform_indices = @transform_3, window_bounds = array<i64: 3, 128, 128>}, {pipeline_mode = #tpu.pipeline_mode<synchronous>, transform_indices = @transform_4, window_bounds = array<i64: 1, 128>}, {transform_indices = @transform_5, window_bounds = array<i64: 1, 12, 128>}]} {
    %c0 = arith.constant 0 : index
    %c0_0 = arith.constant 0 : index
    %c0_1 = arith.constant 0 : index
    %0 = vector.load %arg1[%c0, %c0_0, %c0_1] : memref<1x16x64xbf16, #tpu.memory_space<vmem>>, vector<1x16x64xbf16>
    %1 = vector.shape_cast %0 : vector<1x16x64xbf16> to vector<16x64xbf16>
    %2 = vector.extract_strided_slice %1 {offsets = [0, 0], sizes = [14, 64], strides = [1, 1]} : vector<16x64xbf16> to vector<14x64xbf16>
    %c0_2 = arith.constant 0 : index
    %c0_3 = arith.constant 0 : index
    %c0_4 = arith.constant 0 : index
    %3 = vector.load %arg2[%c0_2, %c0_3, %c0_4] : memref<3x64x128xbf16, #tpu.memory_space<vmem>>, vector<1x64x128xbf16>
    %4 = vector.shape_cast %3 : vector<1x64x128xbf16> to vector<64x128xbf16>
    %cst = arith.constant dense<0.000000e+00> : vector<14x128xf32>
    %5 = tpu.matmul %2, %4, %cst {dimension_numbers = #tpu.dot_dimension_numbers<[1], [0], [0], [1], [0, 0, 1, 1], [], []>} : vector<14x64xbf16>, vector<64x128xbf16>, vector<14x128xf32> -> vector<14x128xf32>
    %c0_5 = arith.constant 0 : index
    %c0_6 = arith.constant 0 : index
    %6 = vector.load %arg3[%c0_5, %c0_6] : memref<1x128xf32, #tpu.memory_space<vmem>>, vector<1x128xf32>
    %7 = vector.broadcast %6 : vector<1x128xf32> to vector<14x128xf32>
    %8 = arith.addf %5, %7 : vector<14x128xf32>
    %9 = vector.extract_strided_slice %1 {offsets = [1, 0], sizes = [14, 64], strides = [1, 1]} : vector<16x64xbf16> to vector<14x64xbf16>
    %c1 = arith.constant 1 : index
    %c0_7 = arith.constant 0 : index
    %c0_8 = arith.constant 0 : index
    %10 = vector.load %arg2[%c1, %c0_7, %c0_8] : memref<3x64x128xbf16, #tpu.memory_space<vmem>>, vector<1x64x128xbf16>
    %11 = vector.shape_cast %10 : vector<1x64x128xbf16> to vector<64x128xbf16>
    %cst_9 = arith.constant dense<0.000000e+00> : vector<14x128xf32>
    %12 = tpu.matmul %9, %11, %cst_9 {dimension_numbers = #tpu.dot_dimension_numbers<[1], [0], [0], [1], [0, 0, 1, 1], [], []>} : vector<14x64xbf16>, vector<64x128xbf16>, vector<14x128xf32> -> vector<14x128xf32>
    %13 = arith.addf %8, %12 : vector<14x128xf32>
    %14 = vector.extract_strided_slice %1 {offsets = [2, 0], sizes = [14, 64], strides = [1, 1]} : vector<16x64xbf16> to vector<14x64xbf16>
    %c2 = arith.constant 2 : index
    %c0_10 = arith.constant 0 : index
    %c0_11 = arith.constant 0 : index
    %15 = vector.load %arg2[%c2, %c0_10, %c0_11] : memref<3x64x128xbf16, #tpu.memory_space<vmem>>, vector<1x64x128xbf16>
    %16 = vector.shape_cast %15 : vector<1x64x128xbf16> to vector<64x128xbf16>
    %cst_12 = arith.constant dense<0.000000e+00> : vector<14x128xf32>
    %17 = tpu.matmul %14, %16, %cst_12 {dimension_numbers = #tpu.dot_dimension_numbers<[1], [0], [0], [1], [0, 0, 1, 1], [], []>} : vector<14x64xbf16>, vector<64x128xbf16>, vector<14x128xf32> -> vector<14x128xf32>
    %18 = arith.addf %13, %17 : vector<14x128xf32>
    %cst_13 = arith.constant 0.000000e+00 : f32
    %19 = vector.broadcast %cst_13 : f32 to vector<14x128xf32>
    %20 = arith.maximumf %18, %19 : vector<14x128xf32>
    %21 = arith.truncf %20 : vector<14x128xf32> to vector<14x128xbf16>
    %22 = vector.extract_strided_slice %21 {offsets = [0, 0], sizes = [12, 128], strides = [1, 1]} : vector<14x128xbf16> to vector<12x128xbf16>
    %c0_14 = arith.constant 0 : index
    %c0_15 = arith.constant 0 : index
    %c0_16 = arith.constant 0 : index
    %23 = vector.load %arg4[%c0_14, %c0_15, %c0_16] : memref<3x128x128xbf16, #tpu.memory_space<vmem>>, vector<1x128x128xbf16>
    %24 = vector.shape_cast %23 : vector<1x128x128xbf16> to vector<128x128xbf16>
    %cst_17 = arith.constant dense<0.000000e+00> : vector<12x128xf32>
    %25 = tpu.matmul %22, %24, %cst_17 {dimension_numbers = #tpu.dot_dimension_numbers<[1], [0], [0], [1], [0, 0, 1, 1], [], []>} : vector<12x128xbf16>, vector<128x128xbf16>, vector<12x128xf32> -> vector<12x128xf32>
    %c0_18 = arith.constant 0 : index
    %c0_19 = arith.constant 0 : index
    %26 = vector.load %arg5[%c0_18, %c0_19] : memref<1x128xf32, #tpu.memory_space<vmem>>, vector<1x128xf32>
    %27 = vector.broadcast %26 : vector<1x128xf32> to vector<12x128xf32>
    %28 = arith.addf %25, %27 : vector<12x128xf32>
    %29 = vector.extract_strided_slice %21 {offsets = [1, 0], sizes = [12, 128], strides = [1, 1]} : vector<14x128xbf16> to vector<12x128xbf16>
    %c1_20 = arith.constant 1 : index
    %c0_21 = arith.constant 0 : index
    %c0_22 = arith.constant 0 : index
    %30 = vector.load %arg4[%c1_20, %c0_21, %c0_22] : memref<3x128x128xbf16, #tpu.memory_space<vmem>>, vector<1x128x128xbf16>
    %31 = vector.shape_cast %30 : vector<1x128x128xbf16> to vector<128x128xbf16>
    %cst_23 = arith.constant dense<0.000000e+00> : vector<12x128xf32>
    %32 = tpu.matmul %29, %31, %cst_23 {dimension_numbers = #tpu.dot_dimension_numbers<[1], [0], [0], [1], [0, 0, 1, 1], [], []>} : vector<12x128xbf16>, vector<128x128xbf16>, vector<12x128xf32> -> vector<12x128xf32>
    %33 = arith.addf %28, %32 : vector<12x128xf32>
    %34 = vector.extract_strided_slice %21 {offsets = [2, 0], sizes = [12, 128], strides = [1, 1]} : vector<14x128xbf16> to vector<12x128xbf16>
    %c2_24 = arith.constant 2 : index
    %c0_25 = arith.constant 0 : index
    %c0_26 = arith.constant 0 : index
    %35 = vector.load %arg4[%c2_24, %c0_25, %c0_26] : memref<3x128x128xbf16, #tpu.memory_space<vmem>>, vector<1x128x128xbf16>
    %36 = vector.shape_cast %35 : vector<1x128x128xbf16> to vector<128x128xbf16>
    %cst_27 = arith.constant dense<0.000000e+00> : vector<12x128xf32>
    %37 = tpu.matmul %34, %36, %cst_27 {dimension_numbers = #tpu.dot_dimension_numbers<[1], [0], [0], [1], [0, 0, 1, 1], [], []>} : vector<12x128xbf16>, vector<128x128xbf16>, vector<12x128xf32> -> vector<12x128xf32>
    %38 = arith.addf %33, %37 : vector<12x128xf32>
    %cst_28 = arith.constant 0.000000e+00 : f32
    %39 = vector.broadcast %cst_28 : f32 to vector<12x128xf32>
    %40 = arith.maximumf %38, %39 : vector<12x128xf32>
    %c0_29 = arith.constant 0 : index
    %c0_30 = arith.constant 0 : index
    %c0_31 = arith.constant 0 : index
    %41 = vector.load %arg6[%c0_29, %c0_30, %c0_31] : memref<1x12x128xf32, #tpu.memory_space<vmem>>, vector<1x12x128xf32>
    %42 = vector.shape_cast %41 : vector<1x12x128xf32> to vector<12x128xf32>
    %43 = vector.shape_cast %40 : vector<12x128xf32> to vector<1x12x128xf32>
    tpu.vector_store %arg6[%c0_29, %c0_30, %c0_31], %43 {strides = array<i32>} : memref<1x12x128xf32, #tpu.memory_space<vmem>>, vector<1x12x128xf32>,
    return
  }
  func.func @transform_0(%arg0: i32) -> (i32, i32, i32) {
    %c0_i32 = arith.constant 0 : i32
    %c0_i32_0 = arith.constant 0 : i32
    %c0_i32_1 = arith.constant 0 : i32
    return %arg0, %c0_i32, %c0_i32_0 : i32, i32, i32
  }
  func.func @transform_1(%arg0: i32) -> (i32, i32, i32) {
    %c0_i32 = arith.constant 0 : i32
    %c0_i32_0 = arith.constant 0 : i32
    %c0_i32_1 = arith.constant 0 : i32
    %c0_i32_2 = arith.constant 0 : i32
    return %c0_i32, %c0_i32_0, %c0_i32_1 : i32, i32, i32
  }
  func.func @transform_2(%arg0: i32) -> (i32, i32) {
    %c0_i32 = arith.constant 0 : i32
    %c0_i32_0 = arith.constant 0 : i32
    %c0_i32_1 = arith.constant 0 : i32
    return %c0_i32, %c0_i32_0 : i32, i32
  }
  func.func @transform_3(%arg0: i32) -> (i32, i32, i32) {
    %c0_i32 = arith.constant 0 : i32
    %c0_i32_0 = arith.constant 0 : i32
    %c0_i32_1 = arith.constant 0 : i32
    %c0_i32_2 = arith.constant 0 : i32
    return %c0_i32, %c0_i32_0, %c0_i32_1 : i32, i32, i32
  }
  func.func @transform_4(%arg0: i32) -> (i32, i32) {
    %c0_i32 = arith.constant 0 : i32
    %c0_i32_0 = arith.constant 0 : i32
    %c0_i32_1 = arith.constant 0 : i32
    return %c0_i32, %c0_i32_0 : i32, i32
  }
  func.func @transform_5(%arg0: i32) -> (i32, i32, i32) {
    %c0_i32 = arith.constant 0 : i32
    %c0_i32_0 = arith.constant 0 : i32
    %c0_i32_1 = arith.constant 0 : i32
    return %arg0, %c0_i32, %c0_i32_0 : i32, i32, i32
  }
}

</mosaic_0001>

<bundles_post_ra>
// kernel: tpu_custom_call.1
= control target key start
LH: loop header
LB: loop body
LE: loop exit
PB: predicated region body
PF: predicated region fallthrough
CT: control target
= control target key end

     0   :  { %10 = vsyncpa [#allocation3], 0  ;;  %s1622_s0 = inlined_call_operand.hbm [shape: bf16[2,16,64], index: 0, kind: input, shape index: {}]   ;;  %s1623_s1 = inlined_call_operand.hbm [shape: bf16[3,64,128], index: 1, kind: input, shape index: {}]   ;;  %s1624_s2 = inlined_call_operand.vmem [shape: f32[1,128], index: 2, kind: input, shape index: {}]   ;;  %s1625_s3 = inlined_call_operand.hbm [shape: bf16[3,128,128], index: 3, kind: input, shape index: {}]   ;;  %s1626_s4 = inlined_call_operand.vmem [shape: f32[1,128], index: 4, kind: input, shape index: {}]   ;;  %s1627_s5 = inlined_call_operand.vmem [shape: f32[2,12,128], index: 5, kind: output, shape index: {}]  }
   0x1   :  { %12 = vsyncpa [#allocation3 + $0x1], 0 }
   0x2   :  { %13 = vsyncpa [#allocation5], 0  ;;  %s1419_s18 = smov 0   ;;  %s1421_s19 = smov 0  }
   0x3   :  { %s1423_s20 = smov 0   ;;  %s1425_s21 = smov 0  }
   0x4 LB: > { %s1438_s22 = sadd.s32 4294967295, %s1380_s21   ;;  %p39_p0 = scmp.ne.s32.totalorder %s1372_s19, %s1368_s18  ;;  %s1380_s21 = sphi %s1425_s21, %s1642_s21   ;;  %s1376_s20 = sphi %s1423_s20, %s1641_s20   ;;  %s1372_s19 = sphi %s1421_s19, %s1640_s19   ;;  %s1368_s18 = sphi %s1419_s18, %s1639_s18  }
   0x5   : > { %p1628_p1 = scmp.eq.s32.totalorder %s1438_s22, 0  ;;  %p964_p2 = scmp.ge.s32.totalorder %s1380_s21, 1 }
   0x6   : > { %p160_p3 = scmp.lt.s32.totalorder %s1380_s21, 3  ;;  %s1382_s25 = smov [#allocation4]  }
   0x7   : > { %p1446_p4 = por %p1628_p1, %p39_p0  ;;  %s172_s26 = sshll.u32 %s1382_s25, 4  ;;  %s173_s26 = int_to_ptr.vmem [resolvable:$true] %s172_s26 }
   0x8   : > { %p1450_p5 = pnand %p964_p2, %p160_p3  ;;  %s1383_s28 = smov [#allocation6]  }
   0x9   : > { %s1631_s23 = scalar_select %p1446_p4, 1, 0 }
   0xa   : > { %s1632_s24 = scalar_select %p1450_p5, 1, 0 }
   0xb   : > { %p1171_p6 = pneg %p1450_p5  ;;  %s188_s29 = sshll.u32 %s1383_s28, 4  ;;  %s189_s29 = int_to_ptr.vmem [resolvable:$true] %s188_s29 }
   0xc   : > { %s1273_s30 = scalar_lea.vmem %s173_s26, 1536  ;;  %p1281_p12 = scmp.lt.s32.totalorder %s173_s26, %s173_s26 }
   0xd   : > { %p1458_p7 = pnand %p1171_p6, %p1628_p1  ;;  %p1274_p9 = scmp.ne.s32.totalorder %s173_s26, %s1273_s30 }
   0xe   : > { %p1282_p13 = scmp.lt.s32.totalorder %s1273_s30, %s1273_s30 }
   0xf   : > { %p1264_p8 = pneg %p1458_p7 }
  0x10   : > { %p1283_p0 = por %p1282_p13, %p1281_p12 }
  0x11   : > { %p1276_p10 = pnand %p1274_p9, %p1264_p8 }
  0x13   : > { %p1277_p11 = pneg %p1276_p10 }
  0x15   : > { %p1284_p2 = pnand %p1283_p0, %p1277_p11 }
  0x17   : > { %1287 = shalt.err (!%p1284_p2)
}
  0x18   : > { %s1384_s6 = smov 64   ;;  %s1385_s7 = smov 4  }
  0x19   : > { %1174 = dma.hbm_to_vmem [thread:$0]  (!%p1458_p7), %s1623_s1, 1536, %s173_s26, [#allocation5], %s1384_s6, %s1384_s6, %s1385_s7  }
  0x1a   : > { %s1299_s10 = scalar_lea.vmem %s189_s29, 3072  ;;  %p1307_p10 = scmp.lt.s32.totalorder %s189_s29, %s189_s29 }
  0x1b   : > { %p1300_p3 = scmp.ne.s32.totalorder %s189_s29, %s1299_s10  ;;  %p1308_p11 = scmp.lt.s32.totalorder %s1299_s10, %s1299_s10 }
  0x1d   : > { %p1302_p6 = pnand %p1300_p3, %p1264_p8  ;;  %p1309_p12 = por %p1308_p11, %p1307_p10 }
  0x1f   : > { %p1303_p9 = pneg %p1302_p6 }
  0x21   : > { %p1310_p13 = pnand %p1309_p12, %p1303_p9 }
  0x23   : > { %1313 = shalt.err (!%p1310_p13)
}
  0x24   : > { %1177 = dma.hbm_to_vmem [thread:$0]  (!%p1458_p7), %s1625_s3, 3072, %s189_s29, [#allocation5], %s1384_s6, %s1384_s6, %s1385_s7  }
  0x25   : > { %s1487_s13 = sadd.s32 1, %s1380_s21   ;;  %s26_s14 = sadd.s32 1, %s1376_s20 }
  0x26   : > { %s23_s15 = ssub.s32 %s1380_s21, %s1487_s13  ;;  %p33_p8 = scmp.ne.s32.totalorder %s1376_s20, %s1372_s19 }
  0x27   : > { %p24_p0 = scmp.eq.s32.totalorder %s23_s15, 0  ;;  %p34_p2 = scmp.eq.s32.totalorder %s1380_s21, 0 }
  0x28   : > { %p1184_p3 = scmp.lt.s32.totalorder %s1380_s21, 2  ;;  %s205_s16 = sand.u32 1, %s1376_s20  }
  0x29   : > { %s1498_s17 = scalar_select %p24_p0, %s1376_s20, %s26_s14  }
  0x2a   : > { %p35_p6 = por %p34_p2, %p33_p8  ;;  %s968_s18 = sshll.u32 %s205_s16, 3 }
  0x2b   : > { %s1021_s25 = sshll.u32 %s1380_s21, 7  ;;  %s209_s29 = scalar_lea.vmem [#allocation2], %s968_s18 }
  0x2c   : > { %s1504_s28 = scalar_lea.hbm %s1622_s0, %s1021_s25  ;;  %s216_s30 = sshll.u32 %s209_s29, 4  ;;  %s1510_s30 = int_to_ptr.vmem [resolvable:$true] %s216_s30 }
  0x2d   : > { %p1506_p7 = pnand %p1184_p3, %p35_p6  ;;  %s1512_s9 = scalar_lea.sflag [#allocation3], %s205_s16 }
  0x2e   : > { %s1314_s21 = scalar_lea.hbm %s1504_s28, 128  ;;  %s1319_s12 = scalar_lea.hbm %s1622_s0, 256 }
  0x2f   : > { %p1315_p9 = scmp.ne.s32.totalorder %s1504_s28, %s1314_s21  ;;  %p1316_p10 = pneg %p1506_p7 }
  0x30   : > { %p1320_p13 = scmp.lt.s32.totalorder %s1504_s28, %s1622_s0  ;;  %p1321_p8 = scmp.lt.s32.totalorder %s1319_s12, %s1314_s21 }
  0x31   : > { %p1317_p11 = pnand %p1316_p10, %p1315_p9 }
  0x32   : > { %p1322_p0 = por %p1321_p8, %p1320_p13 }
  0x33   : > { %p1318_p12 = pneg %p1317_p11 }
  0x35   : > { %p1323_p2 = pnand %p1322_p0, %p1318_p12 }
  0x37   : > { %1326 = shalt.err (!%p1323_p2)
}
  0x38   : > { %s1327_s16 = scalar_lea.vmem %s1510_s30, 128  ;;  %s1386_s18 = smov [#allocation2]  }
  0x39   : > { %p1328_p3 = scmp.ne.s32.totalorder %s1510_s30, %s1327_s16  ;;  %s1332_s25 = sshll.u32 %s1386_s18, 4  ;;  %s1333_s25 = int_to_ptr.vmem [resolvable:$false] %s1332_s25 }
  0x3a   : > { %s1334_s26 = scalar_lea.vmem %s1333_s25, 256  ;;  %p1335_p11 = scmp.lt.s32.totalorder %s1510_s30, %s1333_s25 }
  0x3b   : > { %p1330_p6 = pnand %p1328_p3, %p1316_p10  ;;  %p1336_p1 = scmp.lt.s32.totalorder %s1334_s26, %s1327_s16 }
  0x3d   : > { %p1331_p9 = pneg %p1330_p6  ;;  %p1337_p4 = por %p1336_p1, %p1335_p11 }
  0x3f   : > { %p1338_p5 = pnand %p1337_p4, %p1331_p9 }
  0x41   : > { %1341 = shalt.err (!%p1338_p5)
}
  0x42   : > { %1181 = dma.hbm_to_vmem [thread:$0]  (!%p1506_p7), %s1504_s28, 128, %s1510_s30, %s1512_s9, %s1384_s6, %s1384_s6, %s1385_s7  }
  0x43   : > { %p1635_p10 = scmp.ne.s32.totalorder %s1632_s24, 0 }
  0x44   : > { %s230_s27 = sand.u32 (!%p1635_p10), 1, %s1372_s19   ;;  %p1636_p1 = scmp.ne.s32.totalorder (!%p1635_p10), %s1631_s23, 0 }
  0x45   : > { %228 = sbr.rel (%p1635_p10) target bundleno = 549 (0x225), region = 40  ;;  %s972_s29 = sshll.u32 (!%p1635_p10), %s230_s27, 3 }
  0x46   : > { %s231_s21 = scalar_lea.sflag (!%p1635_p10), [#allocation3], %s230_s27  ;;  %s234_s10 = scalar_lea.vmem (!%p1635_p10), [#allocation2], %s972_s29 }
  0x4a   : > { %1359 = dma.done.wait (%p1636_p1), %s231_s21, 128  }
  0x4b   : > { %1361 = vsyncadd (%p1636_p1), %s231_s21, 4294967168  ;;  %p1637_p4 = scmp.eq.s32.totalorder %s1438_s22, 0 }
  0x4d   : > { %1363 = dma.done.wait (%p1637_p4), [#allocation5], 4608   ;;  %p1638_p5 = pmov %p1637_p4 }
  0x4e   : > { %v1387_v0 = vmov 0.0   ;;  %vm1388_vm0 = vmmov 0   ;;  %v1225_v1 = vld [vmem:[#allocation4 + $0x18] sm:$0xff]   ;;  %v1227_v3 = vld [vmem:[#allocation4 + $0x10] sm:$0xff]   ;;  %v1229_v5 = vld [vmem:[#allocation4 + $0x8] sm:$0xff]   ;;  %vm321_vm1 = vcmask 523264  }
  0x4f   : > { %1365 = vsyncadd (%p1638_p5), [#allocation5], 4294962688  ;;  %1065 = vmatprep.subr.bf16.mxu0 %v1387_v0  ;;  %1077 = vmatprep.subr.bf16.mxu1 %v1387_v0  ;;  %v1226_v2 = vld [vmem:[#allocation4 + $0x38] sm:$0xff]   ;;  %v1228_v4 = vld [vmem:[#allocation4 + $0x30] sm:$0xff]   ;;  %p269_p7 = scmp.lt.s32.totalorder %s1438_s22, 1 }
  0x50   : > { %1073 = vmatprep.mubr.msk.bf16.mxu0 %vm1388_vm0, %v1387_v0  ;;  %1085 = vmatprep.mubr.msk.bf16.mxu1 %vm1388_vm0, %v1387_v0  ;;  %v1230_v6 = vld [vmem:[#allocation4 + $0x28] sm:$0xff]   ;;  %v1233_v7 = vld [vmem:[%s234_s10] sm:$0xff]   ;;  %v1231_v8 = vld [vmem:[#allocation4] sm:$0xff]  }
  0x51   : > { %1066 = vmatpush3.bf16.msra.mxu0 %v1225_v1  ;;  %1078 = vmatpush3.bf16.msra.mxu1 %v1226_v2  ;;  %v375_v9 = vshrl.u32 %v1233_v7, 16  ;;  %v377_v10 = vshll.u32 %v1233_v7, 16  ;;  %v1232_v11 = vld [vmem:[#allocation4 + $0x20] sm:$0xff]   ;;  %v1234_v13 = vld [vmem:[#allocation4 + $0x58] sm:$0xff]   ;;  %v460_v15 = vrot.slane %v1233_v7, 1  ;;  %v1235_v17 = vld [vmem:[#allocation4 + $0x50] sm:$0xff]  }
  0x52   : > { %1067 = vmatprep.subr.bf16.mxu0 %v1387_v0  ;;  %1079 = vmatprep.subr.bf16.mxu1 %v1387_v0  ;;  %v1238_v16 = vld [vmem:[#allocation6 + $0x38] sm:$0xff]   ;;  %v1239_v18 = vld [vmem:[#allocation6 + $0x30] sm:$0xff]   ;;  %v1236_v19 = vld [vmem:[#allocation4 + $0x48] sm:$0xff]   ;;  %s1644_s22 = smov (!%p269_p7, %s1438_s22), 1 }
  0x53   : > { %v379_v12 = vrot.slane %v377_v10, 1  ;;  %v1237_v20 = vld [vmem:[#allocation4 + $0x40] sm:$0xff]   ;;  %v1240_v21 = vld [vmem:[#allocation6 + $0x78] sm:$0xff]   ;;  %v1241_v22 = vld [vmem:[#allocation6 + $0x28] sm:$0xff]   ;;  %s1022_s28 = sshll.u32 %s1644_s22, 4 }
  0x54   : > { %v1242_v23 = vld [vmem:[#allocation6 + $0x70] sm:$0xff]   ;;  %v1243_v24 = vld [vmem:[#allocation6 + $0x20] sm:$0xff]   ;;  %v1244_v25 = vld [vmem:[#allocation6 + $0x68] sm:$0xff]   ;;  %s273_s9 = scalar_lea.vmem %s1627_s5, %s1022_s28 }
  0x55   : > { %1068 = vmatpush3.bf16.msra.mxu0 %v1227_v3  ;;  %1080 = vmatpush3.bf16.msra.mxu1 %v1228_v4  ;;  %v380_v14 = vor.u32 %v379_v12, %v375_v9  ;;  %v1245_v26 = vld [vmem:[#allocation6 + $0x18] sm:$0xff]   ;;  %v1246_v27 = vld [vmem:[#allocation6 + $0x60] sm:$0xff]   ;;  %v1247_v28 = vld [vmem:[#allocation6 + $0x10] sm:$0xff]  }
  0x56   : > { %1069 = vmatprep.subr.bf16.mxu0 %v1387_v0  ;;  %1081 = vmatprep.subr.bf16.mxu1 %v1387_v0  ;;  %v1248_v29 = vld [vmem:[#allocation6 + $0x58] sm:$0xff]   ;;  %v1249_v30 = vld [vmem:[#allocation6 + $0x8] sm:$0xff]   ;;  %v1250_v31 = vld [vmem:[#allocation6 + $0x50] sm:$0xff]  }
  0x57   : > { %v1251_v32 = vld [vmem:[#allocation6] sm:$0xff]   ;;  %v1252_v33 = vld [vmem:[#allocation6 + $0x48] sm:$0xff]   ;;  %v977_v43 = vld [vmem:[%s1624_s2] ss:$0 sm:$0xff] }
  0x58   : > { %v1254_v34 = vld [vmem:[#allocation6 + $0x40] sm:$0xff]   ;;  %v1253_v56 = vld [vmem:[#allocation6 + $0xb8] sm:$0xff]   ;;  %v1255_v59 = vld [vmem:[#allocation6 + $0xb0] sm:$0xff]  }
  0x59   : > { %1070 = vmatpush3.bf16.msra.mxu0 %v1229_v5  ;;  %1082 = vmatpush3.bf16.msra.mxu1 %v1230_v6  ;;  %v1256_v63 = vld [vmem:[#allocation6 + $0xa8] sm:$0xff]   ;;  %v1257_v1 = vld [vmem:[#allocation6 + $0xa0] sm:$0xff]   ;;  %v1258_v2 = vld [vmem:[#allocation6 + $0x98] sm:$0xff]  }
  0x5a   : > { %1071 = vmatprep.subr.bf16.mxu0 %v1387_v0  ;;  %1083 = vmatprep.subr.bf16.mxu1 %v1387_v0  ;;  %v1259_v3 = vld [vmem:[#allocation6 + $0x90] sm:$0xff]   ;;  %v1260_v4 = vld [vmem:[#allocation6 + $0x88] sm:$0xff]   ;;  %v1261_v5 = vld [vmem:[#allocation6 + $0x80] sm:$0xff]  }
  0x5d   : > { %1072 = vmatpush3.bf16.msra.mxu0 %v1231_v8  ;;  %1084 = vmatpush3.bf16.msra.mxu1 %v1232_v11 }
  0x5e   : > { %1089 = vmatprep.subr.bf16.mxu0 %v1387_v0  ;;  %1101 = vmatprep.subr.bf16.mxu1 %v1387_v0 }
  0x60   : > { %1074 = vmatmul.mubr.msk.bf16.vlgmr.msra.gmra.mxu0 %vm321_vm1, %v1233_v7  ;;  %1086 = vmatmul.mubr.msk.bf16.vlgmr.msra.gmra.mxu1 %vm321_vm1, %v380_v14 }
  0x61   : > { %1090 = vmatpush3.bf16.msra.mxu0 %v1234_v13  ;;  %1097 = vmatprep.mubr.msk.bf16.mxu0 %vm1388_vm0, %v1387_v0 }
  0x62   : > { %1091 = vmatprep.subr.bf16.mxu0 %v1387_v0  ;;  %1102 = vmatpush3.bf16.msra.mxu1 %v1238_v16 }
  0x63   : > { %1117 = vmatprep.mubr.msk.bf16.mxu1 %vm1388_vm0, %v1387_v0  ;;  %1103 = vmatprep.subr.bf16.mxu1 %v1387_v0 }
  0x65   : > { %1092 = vmatpush3.bf16.msra.mxu0 %v1235_v17 }
  0x66   : > { %1093 = vmatprep.subr.bf16.mxu0 %v1387_v0  ;;  %1104 = vmatpush3.bf16.msra.mxu1 %v1239_v18 }
  0x67   : > { %1105 = vmatprep.subr.bf16.mxu1 %v1387_v0 }
  0x69   : > { %1094 = vmatpush3.bf16.msra.mxu0 %v1236_v19 }
  0x6a   : > { %1095 = vmatprep.subr.bf16.mxu0 %v1387_v0  ;;  %1106 = vmatpush3.bf16.msra.mxu1 %v1241_v22 }
  0x6b   : > { %1107 = vmatprep.subr.bf16.mxu1 %v1387_v0 }
  0x6d   : > { %1096 = vmatpush3.bf16.msra.mxu0 %v1237_v20 }
  0x6e   : > { %1121 = vmatprep.subr.bf16.mxu0 %v1387_v0  ;;  %1108 = vmatpush3.bf16.msra.mxu1 %v1243_v24 }
  0x6f   : > { %1109 = vmatprep.subr.bf16.mxu1 %v1387_v0 }
  0x70   : > { %1098 = vmatmul.mubr.msk.bf16.vlgmr.msra.gmra.mxu0 %vm321_vm1, %v460_v15  ;;  %v994_v15 = vld [vmem:[%s1626_s4] ss:$0 sm:$0xff] }
  0x71   : > { %1137 = vmatprep.mubr.msk.bf16.mxu0 %vm1388_vm0, %v1387_v0  ;;  %1122 = vmatpush3.bf16.msra.mxu0 %v1240_v21 }
  0x72   : > { %1123 = vmatprep.subr.bf16.mxu0 %v1387_v0  ;;  %1110 = vmatpush3.bf16.msra.mxu1 %v1245_v26 }
  0x73   : > { %1111 = vmatprep.subr.bf16.mxu1 %v1387_v0 }
  0x75   : > { %1124 = vmatpush3.bf16.msra.mxu0 %v1242_v23 }
  0x76   : > { %1125 = vmatprep.subr.bf16.mxu0 %v1387_v0  ;;  %1112 = vmatpush3.bf16.msra.mxu1 %v1247_v28 }
  0x77   : > { %1113 = vmatprep.subr.bf16.mxu1 %v1387_v0 }
  0x79   : > { %1126 = vmatpush3.bf16.msra.mxu0 %v1244_v25 }
  0x7a   : > { %1127 = vmatprep.subr.bf16.mxu0 %v1387_v0  ;;  %1114 = vmatpush3.bf16.msra.mxu1 %v1249_v30 }
  0x7b   : > { %1115 = vmatprep.subr.bf16.mxu1 %v1387_v0 }
  0x7d   : > { %1128 = vmatpush3.bf16.msra.mxu0 %v1246_v27 }
  0x7e   : > { %1129 = vmatprep.subr.bf16.mxu0 %v1387_v0  ;;  %1116 = vmatpush3.bf16.msra.mxu1 %v1251_v32 }
  0x7f   : > { %1141 = vmatprep.subr.bf16.mxu1 %v1387_v0 }
  0x81   : > { %1130 = vmatpush3.bf16.msra.mxu0 %v1248_v29 }
  0x82   : > { %1131 = vmatprep.subr.bf16.mxu0 %v1387_v0 }
  0x85   : > { %1132 = vmatpush3.bf16.msra.mxu0 %v1250_v31 }
  0x86   : > { %1133 = vmatprep.subr.bf16.mxu0 %v1387_v0 }
  0x89   : > { %1134 = vmatpush3.bf16.msra.mxu0 %v1252_v33 }
  0x8a   : > { %1135 = vmatprep.subr.bf16.mxu0 %v1387_v0 }
  0x8d   : > { %1136 = vmatpush3.bf16.msra.mxu0 %v1254_v34 }
 0x120   : > { %v359_v35 = vpop.f32.mrf.mxu0  ;;  %v442_v36 = vpop.f32.mrf.mxu1 }
 0x121   : > { %v360_v44 = vadd.f32 %v977_v43, %v359_v35 }
 0x122   : > { %v1075_v37 = vpop.f32.mrf.mxu0  ;;  %v1087_v38 = vpop.f32.mrf.mxu1 }
 0x123   : > { %v449_v47 = vadd.f32 %v442_v36, %v360_v44 }
 0x124   : > { %v362_v39 = vpop.f32.mrf.mxu0  ;;  %v445_v40 = vpop.f32.mrf.mxu1 }
 0x125   : > { %v363_v45 = vadd.f32 %v977_v43, %v362_v39 }
 0x126   : > { %v1076_v41 = vpop.f32.mrf.mxu0  ;;  %v1088_v42 = vpop.f32.mrf.mxu1 }
 0x127   : > { %v450_v49 = vadd.f32 %v445_v40, %v363_v45 }
 0x130   : > { %v522_v46 = vpop.f32.mrf.mxu0 }
 0x131   : > { %v529_v50 = vadd.f32 %v522_v46, %v449_v47 }
 0x132   : > { %v1099_v48 = vpop.f32.mrf.mxu0 }
 0x133   : > { %v531_v54 = vmax.f32 %v529_v50, 0.0 }
 0x134   : > { %v525_v51 = vpop.f32.mrf.mxu0 }
 0x135   : > { %v530_v52 = vadd.f32 %v525_v51, %v450_v49 }
 0x136   : > { %v1100_v53 = vpop.f32.mrf.mxu0 }
 0x137   : > { %v532_v55 = vmax.f32 %v530_v52, 0.0 }
 0x139   : > { %v533_v57 = vpack.c.bf16 %v532_v55, %v531_v54 }
 0x13b   : > { %1118 = vmatmul.mubr.bf16.vlgmr.msra.gmra.mxu1 %v533_v57  ;;  %v666_v58 = vshll.u32 %v533_v57, 16  ;;  %v664_v60 = vshrl.u32 %v533_v57, 16  ;;  %v780_v6 = vrot.slane %v533_v57, 1 }
 0x13c   : > { %1142 = vmatpush3.bf16.msra.mxu1 %v1253_v56  ;;  %1157 = vmatprep.mubr.msk.bf16.mxu1 %vm1388_vm0, %v1387_v0 }
 0x13d   : > { %1143 = vmatprep.subr.bf16.mxu1 %v1387_v0  ;;  %v668_v61 = vrot.slane %v666_v58, 1 }
 0x13f   : > { %v669_v62 = vor.u32 %v668_v61, %v664_v60 }
 0x140   : > { %1144 = vmatpush3.bf16.msra.mxu1 %v1255_v59 }
 0x141   : > { %1138 = vmatmul.mubr.bf16.vlgmr.msra.gmra.mxu0 %v669_v62  ;;  %1145 = vmatprep.subr.bf16.mxu1 %v1387_v0 }
 0x144   : > { %1146 = vmatpush3.bf16.msra.mxu1 %v1256_v63 }
 0x145   : > { %1147 = vmatprep.subr.bf16.mxu1 %v1387_v0 }
 0x148   : > { %1148 = vmatpush3.bf16.msra.mxu1 %v1257_v1 }
 0x149   : > { %1149 = vmatprep.subr.bf16.mxu1 %v1387_v0 }
 0x14c   : > { %1150 = vmatpush3.bf16.msra.mxu1 %v1258_v2 }
 0x14d   : > { %1151 = vmatprep.subr.bf16.mxu1 %v1387_v0 }
 0x150   : > { %1152 = vmatpush3.bf16.msra.mxu1 %v1259_v3 }
 0x151   : > { %1153 = vmatprep.subr.bf16.mxu1 %v1387_v0 }
 0x154   : > { %1154 = vmatpush3.bf16.msra.mxu1 %v1260_v4 }
 0x155   : > { %1155 = vmatprep.subr.bf16.mxu1 %v1387_v0 }
 0x158   : > { %1156 = vmatpush3.bf16.msra.mxu1 %v1261_v5 }
 0x15b   : > { %1158 = vmatmul.mubr.bf16.vlgmr.msra.gmra.mxu1 %v780_v6 }
 0x1fb   : > { %v639_v7 = vpop.f32.mrf.mxu1 }
 0x1fc   : > { %v640_v16 = vadd.f32 %v994_v15, %v639_v7 }
 0x1fd   : > { %v1119_v8 = vpop.f32.mrf.mxu1 }
 0x1ff   : > { %v642_v9 = vpop.f32.mrf.mxu1 }
 0x200   : > { %v643_v18 = vadd.f32 %v994_v15, %v642_v9 }
 0x201   : > { %v1120_v10 = vpop.f32.mrf.mxu1  ;;  %v753_v11 = vpop.f32.mrf.mxu0 }
 0x202   : > { %v760_v17 = vadd.f32 %v753_v11, %v640_v16 }
 0x203   : > { %v1139_v12 = vpop.f32.mrf.mxu0 }
 0x205   : > { %v756_v13 = vpop.f32.mrf.mxu0 }
 0x206   : > { %v761_v21 = vadd.f32 %v756_v13, %v643_v18 }
 0x207   : > { %v1140_v14 = vpop.f32.mrf.mxu0 }
 0x21b   : > { %v864_v0 = vpop.f32.mrf.mxu1 }
 0x21c   : > { %v871_v19 = vadd.f32 %v864_v0, %v760_v17 }
 0x21d   : > { %v1159_v20 = vpop.f32.mrf.mxu1 }
 0x21e   : > { %v873_v22 = vmax.f32 %v871_v19, 0.0 }
 0x21f   : > { %v867_v23 = vpop.f32.mrf.mxu1 }
 0x220   : > { %875 = vst [vmem:[%s273_s9] sm:$0xff] %v873_v22  ;;  %v872_v24 = vadd.f32 %v867_v23, %v761_v21 }
 0x221   : > { %v1160_v25 = vpop.f32.mrf.mxu1 }
 0x222   : > { %v874_v26 = vmax.f32 %v872_v24, 0.0 }
 0x224   : > { %876 = vst [vmem:[%s273_s9 + $0x8] sm:$0xf] %v874_v26 }
 0x225 PF: > { %p16_p12 = scmp.ge.s32.totalorder %s1487_s13, 4   ;;  %s1639_s18 = smov %s1372_s19 }
 0x226   : > { %s1640_s19 = smov %s1376_s20  ;;  %s1641_s20 = smov %s1498_s17 }
 0x227   : > { %s1642_s21 = smov %s1487_s13  ;;  %18 = sbr.rel (!%p16_p12) target bundleno = 4 (0x4), region = 92 }
 0x22c   :  { %898 = vsyncpa [#allocation3], 1 }
 0x22d   :  { %900 = vsyncpa [#allocation3 + $0x1], 1 }
 0x22e   :  { %901 = vsyncpa [#allocation5], 1 }

// kernel: tpu_custom_call.1
= control target key start
LH: loop header
LB: loop body
LE: loop exit
PB: predicated region body
PF: predicated region fallthrough
CT: control target
= control target key end

     0   :  { %10 = vsyncpa [#allocation3], 0  ;;  %s1622_s0 = inlined_call_operand.hbm [shape: bf16[2,16,64], index: 0, kind: input, shape index: {}]   ;;  %s1623_s1 = inlined_call_operand.hbm [shape: bf16[3,64,128], index: 1, kind: input, shape index: {}]   ;;  %s1624_s2 = inlined_call_operand.vmem [shape: f32[1,128], index: 2, kind: input, shape index: {}]   ;;  %s1625_s3 = inlined_call_operand.hbm [shape: bf16[3,128,128], index: 3, kind: input, shape index: {}]   ;;  %s1626_s4 = inlined_call_operand.vmem [shape: f32[1,128], index: 4, kind: input, shape index: {}]   ;;  %s1627_s5 = inlined_call_operand.vmem [shape: f32[2,12,128], index: 5, kind: output, shape index: {}]  }
   0x1   :  { %12 = vsyncpa [#allocation3 + $0x1], 0 }
   0x2   :  { %13 = vsyncpa [#allocation5], 0  ;;  %s1419_s18 = smov 0   ;;  %s1421_s19 = smov 0  }
   0x3   :  { %s1423_s20 = smov 0   ;;  %s1425_s21 = smov 0  }
   0x4 LB: > { %s1438_s22 = sadd.s32 4294967295, %s1380_s21   ;;  %p39_p0 = scmp.ne.s32.totalorder %s1372_s19, %s1368_s18  ;;  %s1380_s21 = sphi %s1425_s21, %s1642_s21   ;;  %s1376_s20 = sphi %s1423_s20, %s1641_s20   ;;  %s1372_s19 = sphi %s1421_s19, %s1640_s19   ;;  %s1368_s18 = sphi %s1419_s18, %s1639_s18  }
   0x5   : > { %p1628_p1 = scmp.eq.s32.totalorder %s1438_s22, 0  ;;  %p964_p2 = scmp.ge.s32.totalorder %s1380_s21, 1 }
   0x6   : > { %p160_p3 = scmp.lt.s32.totalorder %s1380_s21, 3  ;;  %s1382_s25 = smov [#allocation4]  }
   0x7   : > { %p1446_p4 = por %p1628_p1, %p39_p0  ;;  %s172_s26 = sshll.u32 %s1382_s25, 4  ;;  %s173_s26 = int_to_ptr.vmem [resolvable:$true] %s172_s26 }
   0x8   : > { %p1450_p5 = pnand %p964_p2, %p160_p3  ;;  %s1383_s28 = smov [#allocation6]  }
   0x9   : > { %s1631_s23 = scalar_select %p1446_p4, 1, 0 }
   0xa   : > { %s1632_s24 = scalar_select %p1450_p5, 1, 0 }
   0xb   : > { %p1171_p6 = pneg %p1450_p5  ;;  %s188_s29 = sshll.u32 %s1383_s28, 4  ;;  %s189_s29 = int_to_ptr.vmem [resolvable:$true] %s188_s29 }
   0xc   : > { %s1273_s30 = scalar_lea.vmem %s173_s26, 1536  ;;  %p1281_p12 = scmp.lt.s32.totalorder %s173_s26, %s173_s26 }
   0xd   : > { %p1458_p7 = pnand %p1171_p6, %p1628_p1  ;;  %p1274_p9 = scmp.ne.s32.totalorder %s173_s26, %s1273_s30 }
   0xe   : > { %p1282_p13 = scmp.lt.s32.totalorder %s1273_s30, %s1273_s30 }
   0xf   : > { %p1264_p8 = pneg %p1458_p7 }
  0x10   : > { %p1283_p0 = por %p1282_p13, %p1281_p12 }
  0x11   : > { %p1276_p10 = pnand %p1274_p9, %p1264_p8 }
  0x13   : > { %p1277_p11 = pneg %p1276_p10 }
  0x15   : > { %p1284_p2 = pnand %p1283_p0, %p1277_p11 }
  0x17   : > { %1287 = shalt.err (!%p1284_p2)
}
  0x18   : > { %s1384_s6 = smov 64   ;;  %s1385_s7 = smov 4  }
  0x19   : > { %1174 = dma.hbm_to_vmem [thread:$0]  (!%p1458_p7), %s1623_s1, 1536, %s173_s26, [#allocation5], %s1384_s6, %s1384_s6, %s1385_s7  }
  0x1a   : > { %s1299_s10 = scalar_lea.vmem %s189_s29, 3072  ;;  %p1307_p10 = scmp.lt.s32.totalorder %s189_s29, %s189_s29 }
  0x1b   : > { %p1300_p3 = scmp.ne.s32.totalorder %s189_s29, %s1299_s10  ;;  %p1308_p11 = scmp.lt.s32.totalorder %s1299_s10, %s1299_s10 }
  0x1d   : > { %p1302_p6 = pnand %p1300_p3, %p1264_p8  ;;  %p1309_p12 = por %p1308_p11, %p1307_p10 }
  0x1f   : > { %p1303_p9 = pneg %p1302_p6 }
  0x21   : > { %p1310_p13 = pnand %p1309_p12, %p1303_p9 }
  0x23   : > { %1313 = shalt.err (!%p1310_p13)
}
  0x24   : > { %1177 = dma.hbm_to_vmem [thread:$0]  (!%p1458_p7), %s1625_s3, 3072, %s189_s29, [#allocation5], %s1384_s6, %s1384_s6, %s1385_s7  }
  0x25   : > { %s1487_s13 = sadd.s32 1, %s1380_s21   ;;  %s26_s14 = sadd.s32 1, %s1376_s20 }
  0x26   : > { %s23_s15 = ssub.s32 %s1380_s21, %s1487_s13  ;;  %p33_p8 = scmp.ne.s32.totalorder %s1376_s20, %s1372_s19 }
  0x27   : > { %p24_p0 = scmp.eq.s32.totalorder %s23_s15, 0  ;;  %p34_p2 = scmp.eq.s32.totalorder %s1380_s21, 0 }
  0x28   : > { %p1184_p3 = scmp.lt.s32.totalorder %s1380_s21, 2  ;;  %s205_s16 = sand.u32 1, %s1376_s20  }
  0x29   : > { %s1498_s17 = scalar_select %p24_p0, %s1376_s20, %s26_s14  }
  0x2a   : > { %p35_p6 = por %p34_p2, %p33_p8  ;;  %s968_s18 = sshll.u32 %s205_s16, 3 }
  0x2b   : > { %s1021_s25 = sshll.u32 %s1380_s21, 7  ;;  %s209_s29 = scalar_lea.vmem [#allocation2], %s968_s18 }
  0x2c   : > { %s1504_s28 = scalar_lea.hbm %s1622_s0, %s1021_s25  ;;  %s216_s30 = sshll.u32 %s209_s29, 4  ;;  %s1510_s30 = int_to_ptr.vmem [resolvable:$true] %s216_s30 }
  0x2d   : > { %p1506_p7 = pnand %p1184_p3, %p35_p6  ;;  %s1512_s9 = scalar_lea.sflag [#allocation3], %s205_s16 }
  0x2e   : > { %s1314_s21 = scalar_lea.hbm %s1504_s28, 128  ;;  %s1319_s12 = scalar_lea.hbm %s1622_s0, 256 }
  0x2f   : > { %p1315_p9 = scmp.ne.s32.totalorder %s1504_s28, %s1314_s21  ;;  %p1316_p10 = pneg %p1506_p7 }
  0x30   : > { %p1320_p13 = scmp.lt.s32.totalorder %s1504_s28, %s1622_s0  ;;  %p1321_p8 = scmp.lt.s32.totalorder %s1319_s12, %s1314_s21 }
  0x31   : > { %p1317_p11 = pnand %p1316_p10, %p1315_p9 }
  0x32   : > { %p1322_p0 = por %p1321_p8, %p1320_p13 }
  0x33   : > { %p1318_p12 = pneg %p1317_p11 }
  0x35   : > { %p1323_p2 = pnand %p1322_p0, %p1318_p12 }
  0x37   : > { %1326 = shalt.err (!%p1323_p2)
}
  0x38   : > { %s1327_s16 = scalar_lea.vmem %s1510_s30, 128  ;;  %s1386_s18 = smov [#allocation2]  }
  0x39   : > { %p1328_p3 = scmp.ne.s32.totalorder %s1510_s30, %s1327_s16  ;;  %s1332_s25 = sshll.u32 %s1386_s18, 4  ;;  %s1333_s25 = int_to_ptr.vmem [resolvable:$false] %s1332_s25 }
  0x3a   : > { %s1334_s26 = scalar_lea.vmem %s1333_s25, 256  ;;  %p1335_p11 = scmp.lt.s32.totalorder %s1510_s30, %s1333_s25 }
  0x3b   : > { %p1330_p6 = pnand %p1328_p3, %p1316_p10  ;;  %p1336_p1 = scmp.lt.s32.totalorder %s1334_s26, %s1327_s16 }
  0x3d   : > { %p1331_p9 = pneg %p1330_p6  ;;  %p1337_p4 = por %p1336_p1, %p1335_p11 }
  0x3f   : > { %p1338_p5 = pnand %p1337_p4, %p1331_p9 }
  0x41   : > { %1341 = shalt.err (!%p1338_p5)
}
  0x42   : > { %1181 = dma.hbm_to_vmem [thread:$0]  (!%p1506_p7), %s1504_s28, 128, %s1510_s30, %s1512_s9, %s1384_s6, %s1384_s6, %s1385_s7  }
  0x43   : > { %p1635_p10 = scmp.ne.s32.totalorder %s1632_s24, 0 }
  0x44   : > { %s230_s27 = sand.u32 (!%p1635_p10), 1, %s1372_s19   ;;  %p1636_p1 = scmp.ne.s32.totalorder (!%p1635_p10), %s1631_s23, 0 }
  0x45   : > { %228 = sbr.rel (%p1635_p10) target bundleno = 549 (0x225), region = 40  ;;  %s972_s29 = sshll.u32 (!%p1635_p10), %s230_s27, 3 }
  0x46   : > { %s231_s21 = scalar_lea.sflag (!%p1635_p10), [#allocation3], %s230_s27  ;;  %s234_s10 = scalar_lea.vmem (!%p1635_p10), [#allocation2], %s972_s29 }
  0x4a   : > { %1359 = dma.done.wait (%p1636_p1), %s231_s21, 128  }
  0x4b   : > { %1361 = vsyncadd (%p1636_p1), %s231_s21, 4294967168  ;;  %p1637_p4 = scmp.eq.s32.totalorder %s1438_s22, 0 }
  0x4d   : > { %1363 = dma.done.wait (%p1637_p4), [#allocation5], 4608   ;;  %p1638_p5 = pmov %p1637_p4 }
  0x4e   : > { %v1387_v0 = vmov 0.0   ;;  %vm1388_vm0 = vmmov 0   ;;  %v1225_v1 = vld [vmem:[#allocation4 + $0x18] sm:$0xff]   ;;  %v1227_v3 = vld [vmem:[#allocation4 + $0x10] sm:$0xff]   ;;  %v1229_v5 = vld [vmem:[#allocation4 + $0x8] sm:$0xff]   ;;  %vm321_vm1 = vcmask 523264  }
  0x4f   : > { %1365 = vsyncadd (%p1638_p5), [#allocation5], 4294962688  ;;  %1065 = vmatprep.subr.bf16.mxu0 %v1387_v0  ;;  %1077 = vmatprep.subr.bf16.mxu1 %v1387_v0  ;;  %v1226_v2 = vld [vmem:[#allocation4 + $0x38] sm:$0xff]   ;;  %v1228_v4 = vld [vmem:[#allocation4 + $0x30] sm:$0xff]   ;;  %p269_p7 = scmp.lt.s32.totalorder %s1438_s22, 1 }
  0x50   : > { %1073 = vmatprep.mubr.msk.bf16.mxu0 %vm1388_vm0, %v1387_v0  ;;  %1085 = vmatprep.mubr.msk.bf16.mxu1 %vm1388_vm0, %v1387_v0  ;;  %v1230_v6 = vld [vmem:[#allocation4 + $0x28] sm:$0xff]   ;;  %v1233_v7 = vld [vmem:[%s234_s10] sm:$0xff]   ;;  %v1231_v8 = vld [vmem:[#allocation4] sm:$0xff]  }
  0x51   : > { %1066 = vmatpush3.bf16.msra.mxu0 %v1225_v1  ;;  %1078 = vmatpush3.bf16.msra.mxu1 %v1226_v2  ;;  %v375_v9 = vshrl.u32 %v1233_v7, 16  ;;  %v377_v10 = vshll.u32 %v1233_v7, 16  ;;  %v1232_v11 = vld [vmem:[#allocation4 + $0x20] sm:$0xff]   ;;  %v1234_v13 = vld [vmem:[#allocation4 + $0x58] sm:$0xff]   ;;  %v460_v15 = vrot.slane %v1233_v7, 1  ;;  %v1235_v17 = vld [vmem:[#allocation4 + $0x50] sm:$0xff]  }
  0x52   : > { %1067 = vmatprep.subr.bf16.mxu0 %v1387_v0  ;;  %1079 = vmatprep.subr.bf16.mxu1 %v1387_v0  ;;  %v1238_v16 = vld [vmem:[#allocation6 + $0x38] sm:$0xff]   ;;  %v1239_v18 = vld [vmem:[#allocation6 + $0x30] sm:$0xff]   ;;  %v1236_v19 = vld [vmem:[#allocation4 + $0x48] sm:$0xff]   ;;  %s1644_s22 = smov (!%p269_p7, %s1438_s22), 1 }
  0x53   : > { %v379_v12 = vrot.slane %v377_v10, 1  ;;  %v1237_v20 = vld [vmem:[#allocation4 + $0x40] sm:$0xff]   ;;  %v1240_v21 = vld [vmem:[#allocation6 + $0x78] sm:$0xff]   ;;  %v1241_v22 = vld [vmem:[#allocation6 + $0x28] sm:$0xff]   ;;  %s1022_s28 = sshll.u32 %s1644_s22, 4 }
  0x54   : > { %v1242_v23 = vld [vmem:[#allocation6 + $0x70] sm:$0xff]   ;;  %v1243_v24 = vld [vmem:[#allocation6 + $0x20] sm:$0xff]   ;;  %v1244_v25 = vld [vmem:[#allocation6 + $0x68] sm:$0xff]   ;;  %s273_s9 = scalar_lea.vmem %s1627_s5, %s1022_s28 }
  0x55   : > { %1068 = vmatpush3.bf16.msra.mxu0 %v1227_v3  ;;  %1080 = vmatpush3.bf16.msra.mxu1 %v1228_v4  ;;  %v380_v14 = vor.u32 %v379_v12, %v375_v9  ;;  %v1245_v26 = vld [vmem:[#allocation6 + $0x18] sm:$0xff]   ;;  %v1246_v27 = vld [vmem:[#allocation6 + $0x60] sm:$0xff]   ;;  %v1247_v28 = vld [vmem:[#allocation6 + $0x10] sm:$0xff]  }
  0x56   : > { %1069 = vmatprep.subr.bf16.mxu0 %v1387_v0  ;;  %1081 = vmatprep.subr.bf16.mxu1 %v1387_v0  ;;  %v1248_v29 = vld [vmem:[#allocation6 + $0x58] sm:$0xff]   ;;  %v1249_v30 = vld [vmem:[#allocation6 + $0x8] sm:$0xff]   ;;  %v1250_v31 = vld [vmem:[#allocation6 + $0x50] sm:$0xff]  }
  0x57   : > { %v1251_v32 = vld [vmem:[#allocation6] sm:$0xff]   ;;  %v1252_v33 = vld [vmem:[#allocation6 + $0x48] sm:$0xff]   ;;  %v977_v43 = vld [vmem:[%s1624_s2] ss:$0 sm:$0xff] }
  0x58   : > { %v1254_v34 = vld [vmem:[#allocation6 + $0x40] sm:$0xff]   ;;  %v1253_v56 = vld [vmem:[#allocation6 + $0xb8] sm:$0xff]   ;;  %v1255_v59 = vld [vmem:[#allocation6 + $0xb0] sm:$0xff]  }
  0x59   : > { %1070 = vmatpush3.bf16.msra.mxu0 %v1229_v5  ;;  %1082 = vmatpush3.bf16.msra.mxu1 %v1230_v6  ;;  %v1256_v63 = vld [vmem:[#allocation6 + $0xa8] sm:$0xff]   ;;  %v1257_v1 = vld [vmem:[#allocation6 + $0xa0] sm:$0xff]   ;;  %v1258_v2 = vld [vmem:[#allocation6 + $0x98] sm:$0xff]  }
  0x5a   : > { %1071 = vmatprep.subr.bf16.mxu0 %v1387_v0  ;;  %1083 = vmatprep.subr.bf16.mxu1 %v1387_v0  ;;  %v1259_v3 = vld [vmem:[#allocation6 + $0x90] sm:$0xff]   ;;  %v1260_v4 = vld [vmem:[#allocation6 + $0x88] sm:$0xff]   ;;  %v1261_v5 = vld [vmem:[#allocation6 + $0x80] sm:$0xff]  }
  0x5d   : > { %1072 = vmatpush3.bf16.msra.mxu0 %v1231_v8  ;;  %1084 = vmatpush3.bf16.msra.mxu1 %v1232_v11 }
  0x5e   : > { %1089 = vmatprep.subr.bf16.mxu0 %v1387_v0  ;;  %1101 = vmatprep.subr.bf16.mxu1 %v1387_v0 }
  0x60   : > { %1074 = vmatmul.mubr.msk.bf16.vlgmr.msra.gmra.mxu0 %vm321_vm1, %v1233_v7  ;;  %1086 = vmatmul.mubr.msk.bf16.vlgmr.msra.gmra.mxu1 %vm321_vm1, %v380_v14 }
  0x61   : > { %1090 = vmatpush3.bf16.msra.mxu0 %v1234_v13  ;;  %1097 = vmatprep.mubr.msk.bf16.mxu0 %vm1388_vm0, %v1387_v0 }
  0x62   : > { %1091 = vmatprep.subr.bf16.mxu0 %v1387_v0  ;;  %1102 = vmatpush3.bf16.msra.mxu1 %v1238_v16 }
  0x63   : > { %1117 = vmatprep.mubr.msk.bf16.mxu1 %vm1388_vm0, %v1387_v0  ;;  %1103 = vmatprep.subr.bf16.mxu1 %v1387_v0 }
  0x65   : > { %1092 = vmatpush3.bf16.msra.mxu0 %v1235_v17 }
  0x66   : > { %1093 = vmatprep.subr.bf16.mxu0 %v1387_v0  ;;  %1104 = vmatpush3.bf16.msra.mxu1 %v1239_v18 }
  0x67   : > { %1105 = vmatprep.subr.bf16.mxu1 %v1387_v0 }
  0x69   : > { %1094 = vmatpush3.bf16.msra.mxu0 %v1236_v19 }
  0x6a   : > { %1095 = vmatprep.subr.bf16.mxu0 %v1387_v0  ;;  %1106 = vmatpush3.bf16.msra.mxu1 %v1241_v22 }
  0x6b   : > { %1107 = vmatprep.subr.bf16.mxu1 %v1387_v0 }
  0x6d   : > { %1096 = vmatpush3.bf16.msra.mxu0 %v1237_v20 }
  0x6e   : > { %1121 = vmatprep.subr.bf16.mxu0 %v1387_v0  ;;  %1108 = vmatpush3.bf16.msra.mxu1 %v1243_v24 }
  0x6f   : > { %1109 = vmatprep.subr.bf16.mxu1 %v1387_v0 }
  0x70   : > { %1098 = vmatmul.mubr.msk.bf16.vlgmr.msra.gmra.mxu0 %vm321_vm1, %v460_v15  ;;  %v994_v15 = vld [vmem:[%s1626_s4] ss:$0 sm:$0xff] }
  0x71   : > { %1137 = vmatprep.mubr.msk.bf16.mxu0 %vm1388_vm0, %v1387_v0  ;;  %1122 = vmatpush3.bf16.msra.mxu0 %v1240_v21 }
  0x72   : > { %1123 = vmatprep.subr.bf16.mxu0 %v1387_v0  ;;  %1110 = vmatpush3.bf16.msra.mxu1 %v1245_v26 }
  0x73   : > { %1111 = vmatprep.subr.bf16.mxu1 %v1387_v0 }
  0x75   : > { %1124 = vmatpush3.bf16.msra.mxu0 %v1242_v23 }
  0x76   : > { %1125 = vmatprep.subr.bf16.mxu0 %v1387_v0  ;;  %1112 = vmatpush3.bf16.msra.mxu1 %v1247_v28 }
  0x77   : > { %1113 = vmatprep.subr.bf16.mxu1 %v1387_v0 }
  0x79   : > { %1126 = vmatpush3.bf16.msra.mxu0 %v1244_v25 }
  0x7a   : > { %1127 = vmatprep.subr.bf16.mxu0 %v1387_v0  ;;  %1114 = vmatpush3.bf16.msra.mxu1 %v1249_v30 }
  0x7b   : > { %1115 = vmatprep.subr.bf16.mxu1 %v1387_v0 }
  0x7d   : > { %1128 = vmatpush3.bf16.msra.mxu0 %v1246_v27 }
  0x7e   : > { %1129 = vmatprep.subr.bf16.mxu0 %v1387_v0  ;;  %1116 = vmatpush3.bf16.msra.mxu1 %v1251_v32 }
  0x7f   : > { %1141 = vmatprep.subr.bf16.mxu1 %v1387_v0 }
  0x81   : > { %1130 = vmatpush3.bf16.msra.mxu0 %v1248_v29 }
  0x82   : > { %1131 = vmatprep.subr.bf16.mxu0 %v1387_v0 }
  0x85   : > { %1132 = vmatpush3.bf16.msra.mxu0 %v1250_v31 }
  0x86   : > { %1133 = vmatprep.subr.bf16.mxu0 %v1387_v0 }
  0x89   : > { %1134 = vmatpush3.bf16.msra.mxu0 %v1252_v33 }
  0x8a   : > { %1135 = vmatprep.subr.bf16.mxu0 %v1387_v0 }
  0x8d   : > { %1136 = vmatpush3.bf16.msra.mxu0 %v1254_v34 }
 0x120   : > { %v359_v35 = vpop.f32.mrf.mxu0  ;;  %v442_v36 = vpop.f32.mrf.mxu1 }
 0x121   : > { %v360_v44 = vadd.f32 %v977_v43, %v359_v35 }
 0x122   : > { %v1075_v37 = vpop.f32.mrf.mxu0  ;;  %v1087_v38 = vpop.f32.mrf.mxu1 }
 0x123   : > { %v449_v47 = vadd.f32 %v442_v36, %v360_v44 }
 0x124   : > { %v362_v39 = vpop.f32.mrf.mxu0  ;;  %v445_v40 = vpop.f32.mrf.mxu1 }
 0x125   : > { %v363_v45 = vadd.f32 %v977_v43, %v362_v39 }
 0x126   : > { %v1076_v41 = vpop.f32.mrf.mxu0  ;;  %v1088_v42 = vpop.f32.mrf.mxu1 }
 0x127   : > { %v450_v49 = vadd.f32 %v445_v40, %v363_v45 }
 0x130   : > { %v522_v46 = vpop.f32.mrf.mxu0 }
 0x131   : > { %v529_v50 = vadd.f32 %v522_v46, %v449_v47 }
 0x132   : > { %v1099_v48 = vpop.f32.mrf.mxu0 }
 0x133   : > { %v531_v54 = vmax.f32 %v529_v50, 0.0 }
 0x134   : > { %v525_v51 = vpop.f32.mrf.mxu0 }
 0x135   : > { %v530_v52 = vadd.f32 %v525_v51, %v450_v49 }
 0x136   : > { %v1100_v53 = vpop.f32.mrf.mxu0 }
 0x137   : > { %v532_v55 = vmax.f32 %v530_v52, 0.0 }
 0x139   : > { %v533_v57 = vpack.c.bf16 %v532_v55, %v531_v54 }
 0x13b   : > { %1118 = vmatmul.mubr.bf16.vlgmr.msra.gmra.mxu1 %v533_v57  ;;  %v666_v58 = vshll.u32 %v533_v57, 16  ;;  %v664_v60 = vshrl.u32 %v533_v57, 16  ;;  %v780_v6 = vrot.slane %v533_v57, 1 }
 0x13c   : > { %1142 = vmatpush3.bf16.msra.mxu1 %v1253_v56  ;;  %1157 = vmatprep.mubr.msk.bf16.mxu1 %vm1388_vm0, %v1387_v0 }
 0x13d   : > { %1143 = vmatprep.subr.bf16.mxu1 %v1387_v0  ;;  %v668_v61 = vrot.slane %v666_v58, 1 }
 0x13f   : > { %v669_v62 = vor.u32 %v668_v61, %v664_v60 }
 0x140   : > { %1144 = vmatpush3.bf16.msra.mxu1 %v1255_v59 }
 0x141   : > { %1138 = vmatmul.mubr.bf16.vlgmr.msra.gmra.mxu0 %v669_v62  ;;  %1145 = vmatprep.subr.bf16.mxu1 %v1387_v0 }
 0x144   : > { %1146 = vmatpush3.bf16.msra.mxu1 %v1256_v63 }
 0x145   : > { %1147 = vmatprep.subr.bf16.mxu1 %v1387_v0 }
 0x148   : > { %1148 = vmatpush3.bf16.msra.mxu1 %v1257_v1 }
 0x149   : > { %1149 = vmatprep.subr.bf16.mxu1 %v1387_v0 }
 0x14c   : > { %1150 = vmatpush3.bf16.msra.mxu1 %v1258_v2 }
 0x14d   : > { %1151 = vmatprep.subr.bf16.mxu1 %v1387_v0 }
 0x150   : > { %1152 = vmatpush3.bf16.msra.mxu1 %v1259_v3 }
 0x151   : > { %1153 = vmatprep.subr.bf16.mxu1 %v1387_v0 }
 0x154   : > { %1154 = vmatpush3.bf16.msra.mxu1 %v1260_v4 }
 0x155   : > { %1155 = vmatprep.subr.bf16.mxu1 %v1387_v0 }
 0x158   : > { %1156 = vmatpush3.bf16.msra.mxu1 %v1261_v5 }
 0x15b   : > { %1158 = vmatmul.mubr.bf16.vlgmr.msra.gmra.mxu1 %v780_v6 }
 0x1fb   : > { %v639_v7 = vpop.f32.mrf.mxu1 }
 0x1fc   : > { %v640_v16 = vadd.f32 %v994_v15, %v639_v7 }
 0x1fd   : > { %v1119_v8 = vpop.f32.mrf.mxu1 }
 0x1ff   : > { %v642_v9 = vpop.f32.mrf.mxu1 }
 0x200   : > { %v643_v18 = vadd.f32 %v994_v15, %v642_v9 }
 0x201   : > { %v1120_v10 = vpop.f32.mrf.mxu1  ;;  %v753_v11 = vpop.f32.mrf.mxu0 }
 0x202   : > { %v760_v17 = vadd.f32 %v753_v11, %v640_v16 }
 0x203   : > { %v1139_v12 = vpop.f32.mrf.mxu0 }
 0x205   : > { %v756_v13 = vpop.f32.mrf.mxu0 }
 0x206   : > { %v761_v21 = vadd.f32 %v756_v13, %v643_v18 }
 0x207   : > { %v1140_v14 = vpop.f32.mrf.mxu0 }
 0x21b   : > { %v864_v0 = vpop.f32.mrf.mxu1 }
 0x21c   : > { %v871_v19 = vadd.f32 %v864_v0, %v760_v17 }
 0x21d   : > { %v1159_v20 = vpop.f32.mrf.mxu1 }
 0x21e   : > { %v873_v22 = vmax.f32 %v871_v19, 0.0 }
 0x21f   : > { %v867_v23 = vpop.f32.mrf.mxu1 }
 0x220   : > { %875 = vst [vmem:[%s273_s9] sm:$0xff] %v873_v22  ;;  %v872_v24 = vadd.f32 %v867_v23, %v761_v21 }
 0x221   : > { %v1160_v25 = vpop.f32.mrf.mxu1 }
 0x222   : > { %v874_v26 = vmax.f32 %v872_v24, 0.0 }
 0x224   : > { %876 = vst [vmem:[%s273_s9 + $0x8] sm:$0xf] %v874_v26 }
 0x225 PF: > { %p16_p12 = scmp.ge.s32.totalorder %s1487_s13, 4   ;;  %s1639_s18 = smov %s1372_s19 }
 0x226   : > { %s1640_s19 = smov %s1376_s20  ;;  %s1641_s20 = smov %s1498_s17 }
 0x227   : > { %s1642_s21 = smov %s1487_s13  ;;  %18 = sbr.rel (!%p16_p12) target bundleno = 4 (0x4), region = 92 }
 0x22c   :  { %898 = vsyncpa [#allocation3], 1 }
 0x22d   :  { %900 = vsyncpa [#allocation3 + $0x1], 1 }
 0x22e   :  { %901 = vsyncpa [#allocation5], 1 }

</bundles_post_ra>
